<compile_context>
chip_gen: v5e
topology: v5e:2x2
jax: 0.10.0
libtpu: 0.0.40
codegen_flags: <defaults>
</compile_context>

<pallas_src>
import jax
import jax.numpy as jnp
from jax.experimental import pallas as pl
from jax.experimental.pallas import tpu as pltpu

# ------------------------- problem sizes (small) -------------------------
B = 2                   # batch per branch (anchor / positive) for the demo
C, H, W = 4, 16, 16
D_IN = C * H * W        # 1024
HIDDEN = 128
EMBED = 32
BM = 128                # M-block (rows) for the batched/gridded variant


def _cost_estimate(m_rows, x_bytes):
    return pl.CostEstimate(
        flops=2 * m_rows * (D_IN * HIDDEN + HIDDEN * EMBED),
        transcendentals=0,
        bytes_accessed=(x_bytes
                        + D_IN * HIDDEN * 2      # w1 bf16
                        + HIDDEN * 4             # b1 f32
                        + HIDDEN * EMBED * 2     # w2 bf16
                        + EMBED * 4              # b2 f32
                        + m_rows * EMBED * 4),   # output f32
    )


# ------------------------------ kernels ----------------------------------
def _mlp(x_bf16, w1, b1, w2, b2):
    # bf16 MXU operands, f32 accumulation, f32 VPU bias/ReLU.
    h = jnp.dot(x_bf16, w1, preferred_element_type=jnp.float32)
    h = jnp.maximum(h + b1, 0.0)
    e = jnp.dot(h.astype(jnp.bfloat16), w2, preferred_element_type=jnp.float32)
    return e + b2


def triplet_fused_kernel(a_ref, p_ref, w1_ref, b1_ref, w2_ref, b2_ref, o_ref):
    # a_ref/p_ref: (B, D_IN) f32 — cast to bf16 in-kernel (no wrapper HLO).
    # o_ref: (2B, EMBED) f32 — rows [0:B) anchor, [B:2B) positive == cat(dim=0).
    w1 = w1_ref[...]
    b1 = b1_ref[...]
    w2 = w2_ref[...]
    b2 = b2_ref[...]
    nb = a_ref.shape[0]
    o_ref[0:nb, :] = _mlp(a_ref[...].astype(jnp.bfloat16),
                          w1, b1, w2, b2).astype(o_ref.dtype)
    o_ref[nb:2 * nb, :] = _mlp(p_ref[...].astype(jnp.bfloat16),
                               w1, b1, w2, b2).astype(o_ref.dtype)


def triplet_block_kernel(x_ref, w1_ref, b1_ref, w2_ref, b2_ref, o_ref):
    # One M-block of the fused (2B, D_IN) activation matrix; weights are
    # VMEM-resident across grid steps (constant index_map).
    o_ref[...] = _mlp(x_ref[...].astype(jnp.bfloat16),
                      w1_ref[...], b1_ref[...], w2_ref[...], b2_ref[...]
                      ).astype(o_ref.dtype)


# ------------------------------ wrappers ----------------------------------
@jax.jit
def triplet_net_batch(anchor, positive, w1_bf16, b1, w2_bf16, b2):
    """Small-batch path: [B,C,H,W] x2 (f32) -> [2B, EMBED] f32, single launch,
    everything VMEM-resident, no surrounding HLO glue ops."""
    b = anchor.shape[0]
    a_flat = anchor.reshape(b, -1)    # free bitcast-reshape
    p_flat = positive.reshape(b, -1)
    m = 2 * b
    vmem = pltpu.MemorySpace.VMEM
    return pl.pallas_call(
        triplet_fused_kernel,
        out_shape=jax.ShapeDtypeStruct((m, EMBED), jnp.float32),
        in_specs=[pl.BlockSpec(memory_space=vmem)] * 6,
        out_specs=pl.BlockSpec(memory_space=vmem),
        cost_estimate=_cost_estimate(m, x_bytes=m * D_IN * 4),
    )(a_flat, p_flat, w1_bf16, b1, w2_bf16, b2)


@jax.jit
def triplet_net_batch_batched(anchor, positive, w1_bf16, b1, w2_bf16, b2):
    """Large-batch path (2B multiple of BM): grid over M-blocks; w1/w2/b1/b2
    index_maps are constant so the 256 KiB w1 stays resident across steps;
    the M axis is "parallel" so v7x's two TensorCores split the rows."""
    b = anchor.shape[0]
    m = 2 * b
    assert m % BM == 0, "pad the batch so 2B is a multiple of BM"
    # Concat+cast is a single fused XLA op, amortized over the large matmul.
    x = jnp.concatenate([anchor.reshape(b, -1), positive.reshape(b, -1)],
                        axis=0).astype(jnp.bfloat16)
    return pl.pallas_call(
        triplet_block_kernel,
        out_shape=jax.ShapeDtypeStruct((m, EMBED), jnp.float32),
        grid_spec=pltpu.PrefetchScalarGridSpec(
            num_scalar_prefetch=0,
            grid=(m // BM,),
            in_specs=[
                pl.BlockSpec((BM, D_IN), lambda i: (i, 0)),
                pl.BlockSpec((D_IN, HIDDEN), lambda i: (0, 0)),
                pl.BlockSpec((1, HIDDEN), lambda i: (0, 0)),
                pl.BlockSpec((HIDDEN, EMBED), lambda i: (0, 0)),
                pl.BlockSpec((1, EMBED), lambda i: (0, 0)),
            ],
            out_specs=pl.BlockSpec((BM, EMBED), lambda i: (i, 0)),
        ),
        compiler_params=pltpu.CompilerParams(
            dimension_semantics=("parallel",)),
        cost_estimate=_cost_estimate(m, x_bytes=m * D_IN * 2),
    )(x, w1_bf16, b1, w2_bf16, b2)


# ------------------------- deterministic params --------------------------
def init_params(key):
    """PyTorch-style Linear init (f32 master weights)."""
    k1, k2, k3, k4 = jax.random.split(key, 4)
    lim1 = 1.0 / (D_IN ** 0.5)
    lim2 = 1.0 / (HIDDEN ** 0.5)
    w1 = jax.random.uniform(k1, (D_IN, HIDDEN), jnp.float32, -lim1, lim1)
    b1 = jax.random.uniform(k2, (1, HIDDEN), jnp.float32, -lim1, lim1)
    w2 = jax.random.uniform(k3, (HIDDEN, EMBED), jnp.float32, -lim2, lim2)
    b2 = jax.random.uniform(k4, (1, EMBED), jnp.float32, -lim2, lim2)
    return w1, b1, w2, b2


# ------------------------------ references -------------------------------
def reference_f32(anchor, positive, w1, b1, w2, b2):
    def net(x):
        xf = x.reshape(x.shape[0], -1)
        h = jnp.maximum(xf @ w1 + b1, 0.0)
        return h @ w2 + b2
    return jnp.concatenate([net(anchor), net(positive)], axis=0)


def reference_mixed(anchor, positive, w1_bf16, b1, w2_bf16, b2):
    # Same mixed precision as the kernels: bf16 operands, f32 accumulation.
    def net(x):
        xf = x.reshape(x.shape[0], -1).astype(jnp.bfloat16)
        h = jnp.dot(xf, w1_bf16, preferred_element_type=jnp.float32) + b1
        h = jnp.maximum(h, 0.0)
        return jnp.dot(h.astype(jnp.bfloat16), w2_bf16,
                       preferred_element_type=jnp.float32) + b2
    return jnp.concatenate([net(anchor), net(positive)], axis=0)


if __name__ == "__main__":
    key = jax.random.PRNGKey(0)
    kp, ka, kq = jax.random.split(key, 3)
    w1, b1, w2, b2 = init_params(kp)
    w1_bf16 = w1.astype(jnp.bfloat16)
    w2_bf16 = w2.astype(jnp.bfloat16)

    anchor = jax.random.normal(ka, (B, C, H, W), jnp.float32)
    positive = jax.random.normal(kq, (B, C, H, W), jnp.float32)

    # ---- small-batch (demo-size) fused kernel ----
    out = triplet_net_batch(anchor, positive, w1_bf16, b1, w2_bf16, b2)
    out = jax.block_until_ready(out)
    assert out.shape == (2 * B, EMBED), out.shape

    ref_mp = reference_mixed(anchor, positive, w1_bf16, b1, w2_bf16, b2)
    assert jnp.allclose(out, ref_mp, atol=1e-3, rtol=1e-3), \
        "mismatch vs mixed-precision reference"
    ref32 = reference_f32(anchor, positive, w1, b1, w2, b2)
    assert jnp.allclose(out, ref32, atol=5e-2, rtol=5e-2), \
        "mismatch vs f32 reference"

    # ---- batched / gridded variant (weights amortized across M-blocks) ----
    BL = 128                                   # 2*BL = 256 rows, grid = (2,)
    ka2, kq2 = jax.random.split(jax.random.PRNGKey(1), 2)
    anchor_l = jax.random.normal(ka2, (BL, C, H, W), jnp.float32)
    positive_l = jax.random.normal(kq2, (BL, C, H, W), jnp.float32)
    out_l = triplet_net_batch_batched(anchor_l, positive_l,
                                      w1_bf16, b1, w2_bf16, b2)
    out_l = jax.block_until_ready(out_l)
    assert out_l.shape == (2 * BL, EMBED), out_l.shape
    ref_l = reference_mixed(anchor_l, positive_l, w1_bf16, b1, w2_bf16, b2)
    assert jnp.allclose(out_l, ref_l, atol=1e-3, rtol=1e-3), \
        "batched path mismatch vs mixed-precision reference"

    print("KERNEL_OK")
</pallas_src>

<mosaic_0001>
module attributes {stable_mosaic.version = 11 : i64} {
  func.func @triplet_fused_kernel(%arg0: memref<2x1024xf32, #tpu.memory_space<vmem>>, %arg1: memref<2x1024xf32, #tpu.memory_space<vmem>>, %arg2: memref<1024x128xbf16, #tpu.memory_space<vmem>>, %arg3: memref<1x128xf32, #tpu.memory_space<vmem>>, %arg4: memref<128x32xbf16, #tpu.memory_space<vmem>>, %arg5: memref<1x32xf32, #tpu.memory_space<vmem>>, %arg6: memref<4x32xf32, #tpu.memory_space<vmem>>) attributes {dimension_semantics = [], scalar_prefetch = 0 : i64, scratch_operands = 0 : i64, tpu.core_type = #tpu.core_type<tc>} {
    %c0 = arith.constant 0 : index
    %c0_0 = arith.constant 0 : index
    %0 = vector.load %arg2[%c0, %c0_0] : memref<1024x128xbf16, #tpu.memory_space<vmem>>, vector<1024x128xbf16>
    %c0_1 = arith.constant 0 : index
    %c0_2 = arith.constant 0 : index
    %1 = vector.load %arg3[%c0_1, %c0_2] : memref<1x128xf32, #tpu.memory_space<vmem>>, vector<1x128xf32>
    %c0_3 = arith.constant 0 : index
    %c0_4 = arith.constant 0 : index
    %2 = vector.load %arg4[%c0_3, %c0_4] : memref<128x32xbf16, #tpu.memory_space<vmem>>, vector<128x32xbf16>
    %c0_5 = arith.constant 0 : index
    %c0_6 = arith.constant 0 : index
    %3 = vector.load %arg5[%c0_5, %c0_6] : memref<1x32xf32, #tpu.memory_space<vmem>>, vector<1x32xf32>
    %c0_7 = arith.constant 0 : index
    %c0_8 = arith.constant 0 : index
    %4 = vector.load %arg0[%c0_7, %c0_8] : memref<2x1024xf32, #tpu.memory_space<vmem>>, vector<2x1024xf32>
    %5 = arith.truncf %4 : vector<2x1024xf32> to vector<2x1024xbf16>
    %cst = arith.constant dense<0.000000e+00> : vector<2x128xf32>
    %6 = tpu.matmul %5, %0, %cst {dimension_numbers = #tpu.dot_dimension_numbers<[1], [0], [0], [1], [0, 0, 1, 1], [], []>} : vector<2x1024xbf16>, vector<1024x128xbf16>, vector<2x128xf32> -> vector<2x128xf32>
    %7 = vector.broadcast %1 : vector<1x128xf32> to vector<2x128xf32>
    %8 = arith.addf %6, %7 : vector<2x128xf32>
    %cst_9 = arith.constant 0.000000e+00 : f32
    %9 = vector.broadcast %cst_9 : f32 to vector<2x128xf32>
    %10 = arith.maximumf %8, %9 : vector<2x128xf32>
    %11 = arith.truncf %10 : vector<2x128xf32> to vector<2x128xbf16>
    %cst_10 = arith.constant dense<0.000000e+00> : vector<2x32xf32>
    %12 = tpu.matmul %11, %2, %cst_10 {dimension_numbers = #tpu.dot_dimension_numbers<[1], [0], [0], [1], [0, 0, 1, 1], [], []>} : vector<2x128xbf16>, vector<128x32xbf16>, vector<2x32xf32> -> vector<2x32xf32>
    %13 = vector.broadcast %3 : vector<1x32xf32> to vector<2x32xf32>
    %14 = arith.addf %12, %13 : vector<2x32xf32>
    %c0_11 = arith.constant 0 : index
    %c0_12 = arith.constant 0 : index
    %15 = vector.load %arg6[%c0_11, %c0_12] : memref<4x32xf32, #tpu.memory_space<vmem>>, vector<2x32xf32>
    tpu.vector_store %arg6[%c0_11, %c0_12], %14 {strides = array<i32>} : memref<4x32xf32, #tpu.memory_space<vmem>>, vector<2x32xf32>,
    %c0_13 = arith.constant 0 : index
    %c0_14 = arith.constant 0 : index
    %16 = vector.load %arg1[%c0_13, %c0_14] : memref<2x1024xf32, #tpu.memory_space<vmem>>, vector<2x1024xf32>
    %17 = arith.truncf %16 : vector<2x1024xf32> to vector<2x1024xbf16>
    %cst_15 = arith.constant dense<0.000000e+00> : vector<2x128xf32>
    %18 = tpu.matmul %17, %0, %cst_15 {dimension_numbers = #tpu.dot_dimension_numbers<[1], [0], [0], [1], [0, 0, 1, 1], [], []>} : vector<2x1024xbf16>, vector<1024x128xbf16>, vector<2x128xf32> -> vector<2x128xf32>
    %19 = vector.broadcast %1 : vector<1x128xf32> to vector<2x128xf32>
    %20 = arith.addf %18, %19 : vector<2x128xf32>
    %cst_16 = arith.constant 0.000000e+00 : f32
    %21 = vector.broadcast %cst_16 : f32 to vector<2x128xf32>
    %22 = arith.maximumf %20, %21 : vector<2x128xf32>
    %23 = arith.truncf %22 : vector<2x128xf32> to vector<2x128xbf16>
    %cst_17 = arith.constant dense<0.000000e+00> : vector<2x32xf32>
    %24 = tpu.matmul %23, %2, %cst_17 {dimension_numbers = #tpu.dot_dimension_numbers<[1], [0], [0], [1], [0, 0, 1, 1], [], []>} : vector<2x128xbf16>, vector<128x32xbf16>, vector<2x32xf32> -> vector<2x32xf32>
    %25 = vector.broadcast %3 : vector<1x32xf32> to vector<2x32xf32>
    %26 = arith.addf %24, %25 : vector<2x32xf32>
    %c2 = arith.constant 2 : index
    %c0_18 = arith.constant 0 : index
    %27 = vector.load %arg6[%c2, %c0_18] : memref<4x32xf32, #tpu.memory_space<vmem>>, vector<2x32xf32>
    tpu.vector_store %arg6[%c2, %c0_18], %26 {strides = array<i32>} : memref<4x32xf32, #tpu.memory_space<vmem>>, vector<2x32xf32>,
    return
  }
}

</mosaic_0001>

<bundles_post_ra>
// kernel: triplet_net_batch.1
= control target key start
LH: loop header
LB: loop body
LE: loop exit
PB: predicated region body
PF: predicated region fallthrough
CT: control target
= control target key end

     0   :  { %11 = vsyncpa [#allocation3], 0  ;;  %s1747_s0 = inlined_call_operand.vmem [shape: f32[2,1024], index: 0, kind: input, shape index: {}]   ;;  %s1748_s1 = inlined_call_operand.vmem [shape: f32[2,1024], index: 1, kind: input, shape index: {}]   ;;  %s1749_s2 = inlined_call_operand.hbm [shape: bf16[1024,128], index: 2, kind: input, shape index: {}]   ;;  %s1750_s3 = inlined_call_operand.vmem [shape: f32[1,128], index: 3, kind: input, shape index: {}]   ;;  %s1751_s4 = inlined_call_operand.vmem [shape: bf16[128,32], index: 4, kind: input, shape index: {}]   ;;  %s1752_s5 = inlined_call_operand.vmem [shape: f32[1,32], index: 5, kind: input, shape index: {}]   ;;  %s1753_s6 = inlined_call_operand.hbm [shape: f32[4,32], index: 6, kind: output, shape index: {}]  }
   0x1   :  { %12 = vsyncpa [#allocation4], 0  ;;  %s21_s23 = sshll.u32 %s1749_s2, 4  ;;  %s1362_s24 = smov [#allocation2]   ;;  %s22_s23 = int_to_ptr.hbm [resolvable:$true] %s21_s23 }
   0x2   :  { %s23_s25 = sshll.u32 %s1362_s24, 4  ;;  %s1363_s26 = smov 64   ;;  %s24_s25 = int_to_ptr.vmem [resolvable:$true] %s23_s25 }
   0x3   :  { %s1364_s27 = smov 4  }
   0x4   :  { %29 = dma.hbm_to_vmem [thread:$0]  %s22_s23, 8192, %s24_s25, [#allocation3], %s1363_s26, %s1363_s26, %s1364_s27  }
   0x5   :  { %1358 = dma.done.wait [#allocation3], 8192  }
   0x6   :  { %1359 = vsyncadd [#allocation3], 4294959104  ;;  %v1404_v0 = vld [vmem:[#allocation2 + $0x38] sm:$0xff]  ;;  %v1414_v4 = vld [vmem:[#allocation2 + $0x30] sm:$0xff]  ;;  %vm774_vm0 = vcmask 254976   ;;  %s934_s29 = sshll.u32 %s1753_s6, 4  ;;  %s935_s29 = int_to_ptr.hbm [resolvable:$true] %s934_s29 }
   0x7   :  { %v1406_v1 = vld [vmem:[#allocation2 + $0x78] sm:$0xff]  ;;  %604 = vmatpush.bf16.msra.mxu0 %v1404_v0  ;;  %v1416_v5 = vld [vmem:[#allocation2 + $0x70] sm:$0xff]  ;;  %v1426_v8 = vld [vmem:[#allocation2 + $0x28] sm:$0xff] }
   0x8   :  { %v1408_v2 = vld [vmem:[#allocation2 + $0xb8] sm:$0xff]  ;;  %617 = vmatpush.bf16.msra.mxu1 %v1406_v1  ;;  %v1420_v6 = vld [vmem:[#allocation2 + $0xb0] sm:$0xff]  ;;  %v1428_v9 = vld [vmem:[#allocation2 + $0x68] sm:$0xff] }
   0x9   :  { %v1410_v3 = vld [vmem:[#allocation2 + $0xf8] sm:$0xff]  ;;  %630 = vmatpush.bf16.msra.mxu2 %v1408_v2  ;;  %v1422_v7 = vld [vmem:[#allocation2 + $0xf0] sm:$0xff]  ;;  %v1432_v10 = vld [vmem:[#allocation2 + $0xa8] sm:$0xff] }
   0xa   :  { %643 = vmatpush.bf16.msra.mxu3 %v1410_v3  ;;  %v1434_v11 = vld [vmem:[#allocation2 + $0xe8] sm:$0xff]  ;;  %v1438_v12 = vld [vmem:[#allocation2 + $0x20] sm:$0xff]  ;;  %v186_v16 = vld [vmem:[%s1747_s0] sm:$0xff] }
   0xb   :  { %605 = vmatpush.bf16.msra.mxu0 %v1414_v4  ;;  %v1440_v13 = vld [vmem:[#allocation2 + $0x60] sm:$0xff]  ;;  %v1453_v17 = vld [vmem:[#allocation2 + $0x18] sm:$0xff]  ;;  %190 = vst [vmem:[#allocation1] ss:$4 sm:$0xff] %v186_v16  ;;  %v1463_v21 = vld [vmem:[#allocation2 + $0x10] sm:$0xff] }
   0xc   :  { %618 = vmatpush.bf16.msra.mxu1 %v1416_v5  ;;  %v1444_v14 = vld [vmem:[#allocation2 + $0xa0] sm:$0xff]  ;;  %v1455_v18 = vld [vmem:[#allocation2 + $0x58] sm:$0xff]  ;;  %v1467_v22 = vld [vmem:[#allocation2 + $0x50] sm:$0xff] }
   0xd   :  { %631 = vmatpush.bf16.msra.mxu2 %v1420_v6  ;;  %v1446_v15 = vld [vmem:[#allocation2 + $0xe0] sm:$0xff]  ;;  %v1459_v19 = vld [vmem:[#allocation2 + $0x98] sm:$0xff]  ;;  %v1471_v23 = vld [vmem:[#allocation2 + $0x90] sm:$0xff] }
   0xe   :  { %644 = vmatpush.bf16.msra.mxu3 %v1422_v7  ;;  %v1461_v20 = vld [vmem:[#allocation2 + $0xd8] sm:$0xff]  ;;  %v1473_v24 = vld [vmem:[#allocation2 + $0xd0] sm:$0xff]  ;;  %v1475_v25 = vld [vmem:[#allocation2 + $0x8] sm:$0xff] }
   0xf   :  { %606 = vmatpush.bf16.msra.mxu0 %v1426_v8  ;;  %v1477_v26 = vld [vmem:[#allocation2 + $0x48] sm:$0xff]  ;;  %v776_v27 = vld [vmem:[%s1748_s1] sm:$0xff]  ;;  %v187_v34 = vld [vmem:[%s1747_s0 + $0x8] sm:$0xff] }
  0x10   :  { %619 = vmatpush.bf16.msra.mxu1 %v1428_v9  ;;  %v1486_v32 = vld [vmem:[#allocation2 + $0x88] sm:$0xff]  ;;  %192 = vst [vmem:[#allocation1 + $0x20] ss:$4 sm:$0xff] %v187_v34  ;;  %v1495_v35 = vld [vmem:[#allocation2] sm:$0xff]  ;;  %v1505_v39 = vld [vmem:[#allocation2 + $0x138] sm:$0xff] }
  0x11   :  { %632 = vmatpush.bf16.msra.mxu2 %v1432_v10  ;;  %v1488_v33 = vld [vmem:[#allocation2 + $0xc8] sm:$0xff]  ;;  %v1497_v36 = vld [vmem:[#allocation2 + $0x40] sm:$0xff]  ;;  %v1507_v40 = vld [vmem:[#allocation2 + $0x178] sm:$0xff] }
  0x12   :  { %645 = vmatpush.bf16.msra.mxu3 %v1434_v11  ;;  %v195_v28 = vld.sshfl [vmem:[#allocation1 + $0x10] sm:$0xff pattern:$0x73625140]  ;;  %v193_v29 = vld.sshfl [vmem:[#allocation1] sm:$0xff pattern:$0x73625140] }
  0x13   :  { %607 = vmatpush.bf16.msra.mxu0 %v1438_v12  ;;  %v196_v30 = vld.sshfl [vmem:[#allocation1 + $0x18] sm:$0xff pattern:$0x73625140]  ;;  %v194_v31 = vld.sshfl [vmem:[#allocation1 + $0x8] sm:$0xff pattern:$0x73625140]  ;;  %v211_v43 = vpack.c.bf16 %v195_v28, %v195_v28  ;;  %v209_v44 = vpack.c.bf16 %v193_v29, %v193_v29 }
  0x14   :  { %620 = vmatpush.bf16.msra.mxu1 %v1440_v13  ;;  %1763 = vst [vmem:[#allocation8_spill] sm:$0xff] %v1488_v33  ;;  %v1501_v37 = vld [vmem:[#allocation2 + $0x80] sm:$0xff]  ;;  %v1509_v41 = vld [vmem:[#allocation2 + $0x1b8] sm:$0xff]  ;;  %v1517_v45 = vld [vmem:[#allocation2 + $0x130] sm:$0xff]  ;;  %v212_v47 = vpack.c.bf16 %v196_v30, %v196_v30  ;;  %v210_v48 = vpack.c.bf16 %v194_v31, %v194_v31 }
  0x15   :  { %633 = vmatpush.bf16.msra.mxu2 %v1444_v14  ;;  %780 = vst [vmem:[#allocation1] ss:$4 sm:$0xff] %v776_v27  ;;  %v1503_v38 = vld [vmem:[#allocation2 + $0xc0] sm:$0xff]  ;;  %v1511_v42 = vld [vmem:[#allocation2 + $0x1f8] sm:$0xff]  ;;  %v1519_v46 = vld [vmem:[#allocation2 + $0x170] sm:$0xff] }
  0x16   :  { %646 = vmatpush.bf16.msra.mxu3 %v1446_v15  ;;  %1764 = vst [vmem:[#allocation9_spill] sm:$0xff] %v1503_v38  ;;  %v1523_v49 = vld [vmem:[#allocation2 + $0x1b0] sm:$0xff]  ;;  %v777_v55 = vld [vmem:[%s1748_s1 + $0x8] sm:$0xff]  ;;  %v1542_v56 = vld [vmem:[#allocation2 + $0x128] sm:$0xff] }
  0x17   :  { %608 = vmatpush.bf16.msra.mxu0 %v1453_v17  ;;  %1765 = vst [vmem:[#allocation10_spill] sm:$0xff] %v1511_v42  ;;  %v1525_v50 = vld [vmem:[#allocation2 + $0x1f0] sm:$0xff]  ;;  %v1527_v51 = vld.sshfl [vmem:[#allocation1 + $0x20] sm:$0xff pattern:$0x73625140]  ;;  %v1544_v57 = vld [vmem:[#allocation2 + $0x168] sm:$0xff] }
  0x18   :  { %621 = vmatpush.bf16.msra.mxu1 %v1455_v18  ;;  %1766 = vst [vmem:[#allocation11_spill] sm:$0xff] %v1525_v50  ;;  %v1531_v52 = vld.sshfl [vmem:[#allocation1 + $0x28] sm:$0xff pattern:$0x73625140]  ;;  %v1548_v58 = vld [vmem:[#allocation2 + $0x1a8] sm:$0xff]  ;;  %v1566_v16 = vld [vmem:[#allocation2 + $0x118] sm:$0xff] }
  0x19   :  { %634 = vmatpush.bf16.msra.mxu2 %v1459_v19  ;;  %v1533_v53 = vld.sshfl [vmem:[#allocation1 + $0x30] sm:$0xff pattern:$0x73625140]  ;;  %v1535_v54 = vld.sshfl [vmem:[#allocation1 + $0x38] sm:$0xff pattern:$0x73625140] }
  0x1a   :  { %647 = vmatpush.bf16.msra.mxu3 %v1461_v20  ;;  %782 = vst [vmem:[#allocation1 + $0x20] ss:$4 sm:$0xff] %v777_v55  ;;  %v1550_v59 = vld [vmem:[#allocation2 + $0x1e8] sm:$0xff]  ;;  %v1554_v60 = vld [vmem:[#allocation2 + $0x120] sm:$0xff]  ;;  %v1568_v27 = vld [vmem:[#allocation2 + $0x158] sm:$0xff] }
  0x1b   :  { %609 = vmatpush.bf16.msra.mxu0 %v1463_v21  ;;  %1767 = vst [vmem:[#allocation12_spill] sm:$0xff] %v1550_v59  ;;  %v1556_v61 = vld [vmem:[#allocation2 + $0x160] sm:$0xff]  ;;  %v1572_v28 = vld [vmem:[#allocation2 + $0x198] sm:$0xff]  ;;  %v1578_v30 = vld [vmem:[#allocation2 + $0x110] sm:$0xff] }
  0x1c   :  { %622 = vmatpush.bf16.msra.mxu1 %v1467_v22  ;;  %v1560_v62 = vld [vmem:[#allocation2 + $0x1a0] sm:$0xff]  ;;  %v1574_v29 = vld [vmem:[#allocation2 + $0x1d8] sm:$0xff]  ;;  %v1580_v31 = vld [vmem:[#allocation2 + $0x150] sm:$0xff] }
  0x1d   :  { %635 = vmatpush.bf16.msra.mxu2 %v1471_v23  ;;  %v1562_v63 = vld [vmem:[#allocation2 + $0x1e0] sm:$0xff]  ;;  %1769 = vst [vmem:[#allocation14_spill] sm:$0xff] %v1574_v29  ;;  %v1584_v34 = vld [vmem:[#allocation2 + $0x190] sm:$0xff]  ;;  %v1598_v55 = vld [vmem:[#allocation2 + $0x1c8] sm:$0xff] }
  0x1e   :  { %648 = vmatpush.bf16.msra.mxu3 %v1473_v24  ;;  %1768 = vst [vmem:[#allocation13_spill] sm:$0xff] %v1562_v63 }
  0x1f   :  { %610 = vmatpush.bf16.msra.mxu0 %v1475_v25  ;;  %1771 = vst [vmem:[#allocation16_spill] sm:$0xff] %v1598_v55 }
  0x20   :  { %623 = vmatpush.bf16.msra.mxu1 %v1477_v26 }
  0x21   :  { %636 = vmatpush.bf16.msra.mxu2 %v1486_v32 }
  0x22   :  { %649 = vmatpush.bf16.msra.mxu3 %v1488_v33  ;;  %v216_v33 = vpack.c.bf16 %v1535_v54, %v1535_v54 }
  0x23   :  { %611 = vmatpush.bf16.msra.mxu0 %v1495_v35 }
  0x24   :  { %624 = vmatpush.bf16.msra.mxu1 %v1497_v36 }
  0x25   :  { %637 = vmatpush.bf16.msra.mxu2 %v1501_v37 }
  0x26   :  { %650 = vmatpush.bf16.msra.mxu3 %v1503_v38  ;;  %612 = vmatmul.bf16.vlgmr.msra.gmra.mxu0 %v209_v44  ;;  %v1590_v44 = vld [vmem:[#allocation2 + $0x108] sm:$0xff]  ;;  %v214_v38 = vpack.c.bf16 %v1531_v52, %v1531_v52  ;;  %v1642_v52 = vld [vmem:[%s1751_s4 + $0x28] sm:$0xff] }
  0x27   :  { %656 = vmatpush.bf16.msrb.mxu0 %v1505_v39  ;;  %625 = vmatmul.bf16.vlgmr.msra.gmra.mxu1 %v210_v48  ;;  %v1596_v48 = vld [vmem:[#allocation2 + $0x188] sm:$0xff] }
  0x28   :  { %669 = vmatpush.bf16.msrb.mxu1 %v1507_v40  ;;  %638 = vmatmul.bf16.vlgmr.msra.gmra.mxu2 %v211_v43  ;;  %v1586_v43 = vld [vmem:[#allocation2 + $0x1d0] sm:$0xff] }
  0x29   :  { %682 = vmatpush.bf16.msrb.mxu2 %v1509_v41  ;;  %651 = vmatmul.bf16.vlgmr.msra.gmra.mxu3 %v212_v47  ;;  %1770 = vst [vmem:[#allocation15_spill] sm:$0xff] %v1586_v43  ;;  %v1592_v47 = vld [vmem:[#allocation2 + $0x148] sm:$0xff] }
  0x2a   :  { %695 = vmatpush.bf16.msrb.mxu3 %v1511_v42  ;;  %v213_v42 = vpack.c.bf16 %v1527_v51, %v1527_v51  ;;  %v1633_v51 = vld [vmem:[%s1751_s4 + $0x30] sm:$0xff] }
  0x2b   :  { %657 = vmatpush.bf16.msrb.mxu0 %v1517_v45 }
  0x2c   :  { %670 = vmatpush.bf16.msrb.mxu1 %v1519_v46 }
  0x2d   :  { %683 = vmatpush.bf16.msrb.mxu2 %v1523_v49 }
  0x2e   :  { %696 = vmatpush.bf16.msrb.mxu3 %v1525_v50  ;;  %v1610_v50 = vld [vmem:[#allocation2 + $0x1c0] sm:$0xff] }
  0x2f   :  { %658 = vmatpush.bf16.msrb.mxu0 %v1542_v56 }
  0x30   :  { %671 = vmatpush.bf16.msrb.mxu1 %v1544_v57 }
  0x31   :  { %684 = vmatpush.bf16.msrb.mxu2 %v1548_v58 }
  0x32   :  { %697 = vmatpush.bf16.msrb.mxu3 %v1550_v59  ;;  %v1608_v59 = vld [vmem:[#allocation2 + $0x180] sm:$0xff] }
  0x33   :  { %659 = vmatpush.bf16.msrb.mxu0 %v1554_v60 }
  0x34   :  { %672 = vmatpush.bf16.msrb.mxu1 %v1556_v61 }
  0x35   :  { %685 = vmatpush.bf16.msrb.mxu2 %v1560_v62 }
  0x36   :  { %698 = vmatpush.bf16.msrb.mxu3 %v1562_v63  ;;  %v1604_v63 = vld [vmem:[#allocation2 + $0x140] sm:$0xff] }
  0x37   :  { %660 = vmatpush.bf16.msrb.mxu0 %v1566_v16 }
  0x38   :  { %673 = vmatpush.bf16.msrb.mxu1 %v1568_v27 }
  0x39   :  { %686 = vmatpush.bf16.msrb.mxu2 %v1572_v28 }
  0x3a   :  { %699 = vmatpush.bf16.msrb.mxu3 %v1574_v29  ;;  %v1602_v29 = vld [vmem:[#allocation2 + $0x100] sm:$0xff] }
  0x3b   :  { %661 = vmatpush.bf16.msrb.mxu0 %v1578_v30 }
  0x3c   :  { %674 = vmatpush.bf16.msrb.mxu1 %v1580_v31 }
  0x3d   :  { %687 = vmatpush.bf16.msrb.mxu2 %v1584_v34 }
  0x3e   :  { %700 = vmatpush.bf16.msrb.mxu3 %v1586_v43  ;;  %v1615_v43 = vld [vmem:[%s1751_s4 + $0x38] sm:$0xff] }
  0x3f   :  { %662 = vmatpush.bf16.msrb.mxu0 %v1590_v44 }
  0x40   :  { %675 = vmatpush.bf16.msrb.mxu1 %v1592_v47 }
  0x41   :  { %688 = vmatpush.bf16.msrb.mxu2 %v1596_v48 }
  0x42   :  { %701 = vmatpush.bf16.msrb.mxu3 %v1598_v55  ;;  %v215_v55 = vpack.c.bf16 %v1533_v53, %v1533_v53 }
  0x43   :  { %663 = vmatpush.bf16.msrb.mxu0 %v1602_v29 }
  0x44   :  { %676 = vmatpush.bf16.msrb.mxu1 %v1604_v63 }
  0x45   :  { %689 = vmatpush.bf16.msrb.mxu2 %v1608_v59 }
  0x46   :  { %702 = vmatpush.bf16.msrb.mxu3 %v1610_v50  ;;  %664 = vmatmul.bf16.vlgmr.msrb.gmra.mxu0 %v213_v42 }
  0x47   :  { %761 = vmatpush.bf16.msra.mxu0 %v1615_v43  ;;  %677 = vmatmul.bf16.vlgmr.msrb.gmra.mxu1 %v214_v38 }
  0x48   :  { %690 = vmatmul.bf16.vlgmr.msrb.gmra.mxu2 %v215_v55  ;;  %807 = vmatpush.bf16.msra.mxu1 %v1404_v0  ;;  %v1660_v0 = vld [vmem:[%s1751_s4 + $0x18] sm:$0xff] }
  0x49   :  { %820 = vmatpush.bf16.msra.mxu2 %v1406_v1  ;;  %703 = vmatmul.bf16.vlgmr.msrb.gmra.mxu3 %v216_v33  ;;  %v1651_v1 = vld [vmem:[%s1751_s4 + $0x20] sm:$0xff]  ;;  %v789_v33 = vld.sshfl [vmem:[#allocation1 + $0x30] sm:$0xff pattern:$0x73625140] }
  0x4a   :  { %833 = vmatpush.bf16.msra.mxu3 %v1408_v2  ;;  %v1298_v2 = vld [vmem:[%s1751_s4 + $0x10] sm:$0xff] }
  0x4b   :  { %762 = vmatpush.bf16.msra.mxu0 %v1633_v51 }
  0x4c   :  { %808 = vmatpush.bf16.msra.mxu1 %v1414_v4  ;;  %v1297_v4 = vld [vmem:[%s1751_s4 + $0x8] sm:$0xff] }
  0x4d   :  { %821 = vmatpush.bf16.msra.mxu2 %v1416_v5  ;;  %v1296_v5 = vld [vmem:[%s1751_s4] sm:$0xff] }
  0x4e   :  { %834 = vmatpush.bf16.msra.mxu3 %v1420_v6 }
  0x4f   :  { %763 = vmatpush.bf16.msra.mxu0 %v1642_v52 }
  0x50   :  { %809 = vmatpush.bf16.msra.mxu1 %v1426_v8 }
  0x51   :  { %822 = vmatpush.bf16.msra.mxu2 %v1428_v9 }
  0x52   :  { %835 = vmatpush.bf16.msra.mxu3 %v1432_v10  ;;  %v1772_v10 = vld [vmem:[#allocation8_spill] sm:$0xff] }
  0x53   :  { %764 = vmatpush.bf16.msra.mxu0 %v1651_v1 }
  0x54   :  { %810 = vmatpush.bf16.msra.mxu1 %v1438_v12 }
  0x55   :  { %823 = vmatpush.bf16.msra.mxu2 %v1440_v13 }
  0x56   :  { %836 = vmatpush.bf16.msra.mxu3 %v1444_v14  ;;  %v784_v14 = vld.sshfl [vmem:[#allocation1 + $0x8] sm:$0xff pattern:$0x73625140] }
  0x57   :  { %765 = vmatpush.bf16.msra.mxu0 %v1660_v0 }
  0x58   :  { %811 = vmatpush.bf16.msra.mxu1 %v1453_v17 }
  0x59   :  { %824 = vmatpush.bf16.msra.mxu2 %v1455_v18  ;;  %v785_v18 = vld.sshfl [vmem:[#allocation1 + $0x10] sm:$0xff pattern:$0x73625140] }
  0x5a   :  { %837 = vmatpush.bf16.msra.mxu3 %v1459_v19  ;;  %v1722_v19 = vld [vmem:[%s1750_s3] ss:$0 sm:$0xff] }
  0x5b   :  { %766 = vmatpush.bf16.msra.mxu0 %v1298_v2 }
  0x5c   :  { %812 = vmatpush.bf16.msra.mxu1 %v1463_v21 }
  0x5d   :  { %825 = vmatpush.bf16.msra.mxu2 %v1467_v22 }
  0x5e   :  { %838 = vmatpush.bf16.msra.mxu3 %v1471_v23 }
  0x5f   :  { %767 = vmatpush.bf16.msra.mxu0 %v1297_v4 }
  0x60   :  { %813 = vmatpush.bf16.msra.mxu1 %v1475_v25  ;;  %v788_v25 = vld.sshfl [vmem:[#allocation1 + $0x28] sm:$0xff pattern:$0x73625140] }
  0x61   :  { %826 = vmatpush.bf16.msra.mxu2 %v1477_v26 }
  0x62   :  { %839 = vmatpush.bf16.msra.mxu3 %v1486_v32  ;;  %v804_v32 = vpack.c.bf16 %v788_v25, %v788_v25 }
  0x63   :  { %768 = vmatpush.bf16.msra.mxu0 %v1296_v5 }
  0x64   :  { %814 = vmatpush.bf16.msra.mxu1 %v1495_v35  ;;  %v805_v35 = vpack.c.bf16 %v789_v33, %v789_v33 }
  0x65   :  { %827 = vmatpush.bf16.msra.mxu2 %v1497_v36  ;;  %v787_v36 = vld.sshfl [vmem:[#allocation1 + $0x20] sm:$0xff pattern:$0x73625140] }
  0x66   :  { %840 = vmatpush.bf16.msra.mxu3 %v1501_v37 }
  0x67   :  { %846 = vmatpush.bf16.msrb.mxu0 %v1410_v3  ;;  %v800_v3 = vpack.c.bf16 %v784_v14, %v784_v14 }
  0x68   :  { %859 = vmatpush.bf16.msrb.mxu1 %v1505_v39 }
  0x69   :  { %872 = vmatpush.bf16.msrb.mxu2 %v1507_v40  ;;  %v803_v40 = vpack.c.bf16 %v787_v36, %v787_v36 }
  0x6a   :  { %885 = vmatpush.bf16.msrb.mxu3 %v1509_v41  ;;  %828 = vmatmul.bf16.vlgmr.msra.gmra.mxu2 %v800_v3 }
  0x6b   :  { %847 = vmatpush.bf16.msrb.mxu0 %v1422_v7  ;;  %v1773_v7 = vld [vmem:[#allocation9_spill] sm:$0xff] }
  0x6c   :  { %860 = vmatpush.bf16.msrb.mxu1 %v1517_v45 }
  0x6d   :  { %873 = vmatpush.bf16.msrb.mxu2 %v1519_v46 }
  0x6e   :  { %886 = vmatpush.bf16.msrb.mxu3 %v1523_v49 }
  0x6f   :  { %848 = vmatpush.bf16.msrb.mxu0 %v1434_v11  ;;  %v801_v11 = vpack.c.bf16 %v785_v18, %v785_v18 }
  0x70   :  { %861 = vmatpush.bf16.msrb.mxu1 %v1542_v56 }
  0x71   :  { %874 = vmatpush.bf16.msrb.mxu2 %v1544_v57  ;;  %841 = vmatmul.bf16.vlgmr.msra.gmra.mxu3 %v801_v11 }
  0x72   :  { %887 = vmatpush.bf16.msrb.mxu3 %v1548_v58 }
  0x73   :  { %849 = vmatpush.bf16.msrb.mxu0 %v1446_v15  ;;  %v783_v15 = vld.sshfl [vmem:[#allocation1] sm:$0xff pattern:$0x73625140] }
  0x74   :  { %862 = vmatpush.bf16.msrb.mxu1 %v1554_v60 }
  0x75   :  { %875 = vmatpush.bf16.msrb.mxu2 %v1556_v61  ;;  %v1774_v61 = vld [vmem:[#allocation10_spill] sm:$0xff] }
  0x76   :  { %888 = vmatpush.bf16.msrb.mxu3 %v1560_v62  ;;  %v1775_v62 = vld [vmem:[#allocation11_spill] sm:$0xff] }
  0x77   :  { %850 = vmatpush.bf16.msrb.mxu0 %v1461_v20  ;;  %v799_v20 = vpack.c.bf16 %v783_v15, %v783_v15 }
  0x78   :  { %863 = vmatpush.bf16.msrb.mxu1 %v1566_v16  ;;  %v786_v16 = vld.sshfl [vmem:[#allocation1 + $0x18] sm:$0xff pattern:$0x73625140] }
  0x79   :  { %876 = vmatpush.bf16.msrb.mxu2 %v1568_v27  ;;  %815 = vmatmul.bf16.vlgmr.msra.gmra.mxu1 %v799_v20  ;;  %v802_v27 = vpack.c.bf16 %v786_v16, %v786_v16 }
  0x7a   :  { %889 = vmatpush.bf16.msrb.mxu3 %v1572_v28  ;;  %v1777_v28 = vld [vmem:[#allocation13_spill] sm:$0xff] }
  0x7b   :  { %851 = vmatpush.bf16.msrb.mxu0 %v1473_v24 }
  0x7c   :  { %864 = vmatpush.bf16.msrb.mxu1 %v1578_v30  ;;  %v1779_v30 = vld [vmem:[#allocation15_spill] sm:$0xff] }
  0x7d   :  { %877 = vmatpush.bf16.msrb.mxu2 %v1580_v31  ;;  %v1780_v31 = vld [vmem:[#allocation16_spill] sm:$0xff] }
  0x7e   :  { %890 = vmatpush.bf16.msrb.mxu3 %v1584_v34  ;;  %v790_v34 = vld.sshfl [vmem:[#allocation1 + $0x38] sm:$0xff pattern:$0x73625140] }
  0x7f   :  { %852 = vmatpush.bf16.msrb.mxu0 %v1772_v10 }
  0x80   :  { %865 = vmatpush.bf16.msrb.mxu1 %v1590_v44 }
  0x81   :  { %878 = vmatpush.bf16.msrb.mxu2 %v1592_v47 }
  0x82   :  { %891 = vmatpush.bf16.msrb.mxu3 %v1596_v48 }
  0x83   :  { %853 = vmatpush.bf16.msrb.mxu0 %v1773_v7 }
  0x84   :  { %866 = vmatpush.bf16.msrb.mxu1 %v1602_v29  ;;  %v1778_v29 = vld [vmem:[#allocation14_spill] sm:$0xff] }
  0x85   :  { %879 = vmatpush.bf16.msrb.mxu2 %v1604_v63  ;;  %v1776_v63 = vld [vmem:[#allocation12_spill] sm:$0xff] }
  0x86   :  { %892 = vmatpush.bf16.msrb.mxu3 %v1608_v59 }
  0x88   :  { %913 = vmatpush.bf16.msra.mxu1 %v1615_v43  ;;  %880 = vmatmul.bf16.vlgmr.msrb.gmra.mxu2 %v804_v32  ;;  %v806_v43 = vpack.c.bf16 %v790_v34, %v790_v34 }
  0x89   :  { %893 = vmatmul.bf16.vlgmr.msrb.gmra.mxu3 %v805_v35  ;;  %867 = vmatmul.bf16.vlgmr.msrb.gmra.mxu1 %v803_v40 }
  0x8c   :  { %914 = vmatpush.bf16.msra.mxu1 %v1633_v51 }
  0x90   :  { %915 = vmatpush.bf16.msra.mxu1 %v1642_v52 }
  0x94   :  { %916 = vmatpush.bf16.msra.mxu1 %v1651_v1 }
  0x98   :  { %917 = vmatpush.bf16.msra.mxu1 %v1660_v0 }
  0x9c   :  { %918 = vmatpush.bf16.msra.mxu1 %v1298_v2 }
  0xa0   :  { %919 = vmatpush.bf16.msra.mxu1 %v1297_v4 }
  0xa3   :  { %v613_v6 = vpop.f32.mrf.mxu0 }
  0xa4   :  { %v626_v8 = vpop.f32.mrf.mxu1  ;;  %v614_v23 = vadd.f32 %v1722_v19, %v613_v6  ;;  %920 = vmatpush.bf16.msra.mxu1 %v1296_v5  ;;  %v1309_v6 = vld [vmem:[%s1752_s5] ss:$0 sm:$0xff]  ;;  %s1365_s5 = smov [#allocation5]  }
  0xa5   :  { %s932_s27 = sshll.u32 %s1365_s5, 4  ;;  %s933_s27 = int_to_ptr.vmem [resolvable:$true] %s932_s27 }
  0xa6   :  { %v627_v24 = vadd.f32 %v626_v8, %v614_v23 }
  0xab   :  { %v639_v9 = vpop.f32.mrf.mxu2  ;;  %v615_v13 = vpop.f32.mrf.mxu0 }
  0xac   :  { %v652_v12 = vpop.f32.mrf.mxu3  ;;  %v628_v17 = vpop.f32.mrf.mxu1  ;;  %v640_v26 = vadd.f32 %v639_v9, %v627_v24 }
  0xae   :  { %v653_v37 = vadd.f32 %v652_v12, %v640_v26 }
  0xb3   :  { %v641_v21 = vpop.f32.mrf.mxu2 }
  0xb4   :  { %v654_v22 = vpop.f32.mrf.mxu3 }
  0xc3   :  { %v665_v38 = vpop.f32.mrf.mxu0 }
  0xc4   :  { %v678_v39 = vpop.f32.mrf.mxu1  ;;  %v666_v41 = vadd.f32 %v665_v38, %v653_v37 }
  0xc6   :  { %v679_v42 = vadd.f32 %v678_v39, %v666_v41 }
  0xcb   :  { %v691_v45 = vpop.f32.mrf.mxu2  ;;  %v667_v53 = vpop.f32.mrf.mxu0 }
  0xcc   :  { %v704_v46 = vpop.f32.mrf.mxu3  ;;  %v692_v49 = vadd.f32 %v691_v45, %v679_v42  ;;  %v680_v54 = vpop.f32.mrf.mxu1 }
  0xce   :  { %v705_v56 = vadd.f32 %v704_v46, %v692_v49 }
  0xd0   :  { %v708_v57 = vmax.f32 %v705_v56, 0.0 }
  0xd2   :  { %v709_v58 = vpack.c.bf16 %v708_v57, %v708_v57 }
  0xd3   :  { %v693_v59 = vpop.f32.mrf.mxu2 }
  0xd4   :  { %v706_v60 = vpop.f32.mrf.mxu3  ;;  %769 = vmatmul.bf16.vlgmr.msra.gmra.mxu0 %v709_v58 }
  0xd5   :  { %898 = vmatpush.bf16.msra.mxu0 %v1774_v61 }
  0xd9   :  { %899 = vmatpush.bf16.msra.mxu0 %v1775_v62 }
  0xdd   :  { %900 = vmatpush.bf16.msra.mxu0 %v1776_v63 }
  0xe1   :  { %901 = vmatpush.bf16.msra.mxu0 %v1777_v28 }
  0xe4   :  { %854 = vmatmul.bf16.vlgmr.msrb.gmra.mxu0 %v802_v27 }
  0xe5   :  { %902 = vmatpush.bf16.msra.mxu0 %v1778_v29 }
  0xe9   :  { %903 = vmatpush.bf16.msra.mxu0 %v1779_v30 }
  0xed   :  { %904 = vmatpush.bf16.msra.mxu0 %v1780_v31  ;;  %v829_v47 = vpop.f32.mrf.mxu2 }
  0xf1   :  { %905 = vmatpush.bf16.msra.mxu0 %v1610_v50 }
  0xf4   :  { %906 = vmatmul.bf16.vlgmr.msra.gmra.mxu0 %v806_v43  ;;  %v842_v48 = vpop.f32.mrf.mxu3 }
  0xf5   :  { %v831_v51 = vpop.f32.mrf.mxu2 }
  0xf6   :  { %v816_v44 = vpop.f32.mrf.mxu1 }
  0xf7   :  { %v817_v10 = vadd.f32 %v1722_v19, %v816_v44 }
  0xf9   :  { %v830_v13 = vadd.f32 %v829_v47, %v817_v10 }
  0xfb   :  { %v843_v14 = vadd.f32 %v842_v48, %v830_v13 }
  0xfc   :  { %v844_v52 = vpop.f32.mrf.mxu3 }
  0xfe   :  { %v818_v55 = vpop.f32.mrf.mxu1 }
 0x106   :  { %v868_v1 = vpop.f32.mrf.mxu1 }
 0x10b   :  { %v881_v0 = vpop.f32.mrf.mxu2 }
 0x10c   :  { %v894_v2 = vpop.f32.mrf.mxu3 }
 0x10e   :  { %v870_v4 = vpop.f32.mrf.mxu1 }
 0x113   :  { %v883_v5 = vpop.f32.mrf.mxu2 }
 0x114   :  { %v896_v8 = vpop.f32.mrf.mxu3 }
 0x151   :  { %v770_v9 = vpop.f32.mrf.mxu0 }
 0x152   :  { %v771_v50 = vadd.f32 %v1309_v6, %v770_v9 }
 0x154   :  { %775 = vst.msk [vmem:[#allocation5] sm:$0x3] %vm774_vm0, %v771_v50 }
 0x159   :  { %v772_v12 = vpop.f32.mrf.mxu0 }
 0x161   :  { %v855_v17 = vpop.f32.mrf.mxu0 }
 0x162   :  { %v856_v3 = vadd.f32 %v855_v17, %v843_v14 }
 0x164   :  { %v869_v18 = vadd.f32 %v868_v1, %v856_v3 }
 0x166   :  { %v882_v11 = vadd.f32 %v881_v0, %v869_v18 }
 0x168   :  { %v895_v15 = vadd.f32 %v894_v2, %v882_v11 }
 0x169   :  { %v857_v7 = vpop.f32.mrf.mxu0 }
 0x171   :  { %v907_v20 = vpop.f32.mrf.mxu0 }
 0x172   :  { %v908_v21 = vadd.f32 %v907_v20, %v895_v15 }
 0x174   :  { %v911_v22 = vmax.f32 %v908_v21, 0.0 }
 0x176   :  { %v912_v23 = vpack.c.bf16 %v911_v22, %v911_v22 }
 0x178   :  { %921 = vmatmul.bf16.vlgmr.msra.gmra.mxu1 %v912_v23 }
 0x179   :  { %v909_v24 = vpop.f32.mrf.mxu0 }
 0x1f5   :  { %v922_v19 = vpop.f32.mrf.mxu1 }
 0x1f6   :  { %v923_v25 = vadd.f32 %v1309_v6, %v922_v19 }
 0x1f8   :  { %926 = vst.msk [vmem:[#allocation5 + $0x2] sm:$0x3] %vm774_vm0, %v923_v25 }
 0x1f9   :  { %937 = dma.vmem_to_hbm [thread:$0]  %s933_s27, 64, %s935_s29, [#allocation4]  }
 0x1fd   :  { %v924_v26 = vpop.f32.mrf.mxu1 }
 0x1fe   :  { %1360 = dma.done.wait [#allocation4], 64  }
 0x1ff   :  { %1361 = vsyncadd [#allocation4], 4294967232 }
 0x200   :  { %942 = vsyncpa [#allocation3], 1 }
 0x201   :  { %943 = vsyncpa [#allocation4], 1 }

</bundles_post_ra>
